<compile_context>
chip_gen: v5e
topology: v5e:2x2
jax: 0.10.0
libtpu: 0.0.40
codegen_flags: <defaults>
</compile_context>

<pallas_src>
import functools

import jax
import jax.numpy as jnp
from jax import lax
from jax.experimental import pallas as pl
from jax.experimental.pallas import tpu as pltpu


def _repeated_kernel(u0_ref, x_ref, wh_ref, *rest,
                     layers: int, chains: int, scale: float,
                     has_win: bool, transposed: bool):
    if has_win:
        win_ref, bh_ref, y_ref = rest
    else:
        bh_ref, y_ref = rest
        win_ref = None

    wh = wh_ref[...]                      # (H,H): W_h (transposed layout) or W_h^T
    mm_dtype = wh.dtype                   # f32 default; bf16 opt-in for v6e/v7x MXU
    H = wh.shape[0]

    if transposed:                        # lane-dense: batch on the 128-lane axis
        tb = u0_ref.shape[1]
        sub = tb // chains
        bias = jnp.broadcast_to(bh_ref[...], (H, sub))        # hoisted (no per-layer bcast)
        if has_win:
            xw = jnp.dot(win_ref[...], x_ref[...].astype(mm_dtype),
                         preferred_element_type=jnp.float32)  # (H, tb), loop-invariant
        else:
            xw = x_ref[...].astype(jnp.float32)               # W_in == identity
        us = tuple(u0_ref[:, c * sub:(c + 1) * sub].astype(jnp.float32)
                   for c in range(chains))
        xws = tuple(xw[:, c * sub:(c + 1) * sub] for c in range(chains))
    else:                                 # batch-major (H is a multiple of 128)
        tb = u0_ref.shape[0]
        sub = tb // chains
        bias = jnp.broadcast_to(bh_ref[...], (sub, H))
        if has_win:
            xw = jnp.dot(x_ref[...].astype(mm_dtype), win_ref[...],
                         preferred_element_type=jnp.float32)
        else:
            xw = x_ref[...].astype(jnp.float32)
        us = tuple(u0_ref[c * sub:(c + 1) * sub, :].astype(jnp.float32)
                   for c in range(chains))
        xws = tuple(xw[c * sub:(c + 1) * sub, :] for c in range(chains))

    def layer(_, carry):
        new = []
        for u_c, xw_c in zip(carry, xws):          # independent chains interleaved
            if transposed:
                hid = jnp.dot(wh, u_c.astype(mm_dtype),
                              preferred_element_type=jnp.float32)
            else:
                hid = jnp.dot(u_c.astype(mm_dtype), wh,
                              preferred_element_type=jnp.float32)
            v = (hid + bias) + xw_c                # same add order as the module
            new.append(jnp.tanh(v * scale))        # scalar kept per-layer (exactness)
        return tuple(new)

    unroll = True if layers <= 8 else 4            # partial unroll for deep repeats
    us = lax.fori_loop(0, layers, layer, us, unroll=unroll)

    for c in range(chains):
        out = us[c].astype(y_ref.dtype)
        if transposed:
            y_ref[:, c * sub:(c + 1) * sub] = out
        else:
            y_ref[c * sub:(c + 1) * sub, :] = out


def prepare_params(params, *, matmul_dtype=jnp.float32):
    """One-time glue outside the hot path: both weight orientations, bias col/row,
    identity-W_in detection, optional bf16 weight cast (v6e/v7x MXU path)."""
    W_h = jnp.asarray(params["W_h"], jnp.float32)
    W_in = jnp.asarray(params["W_in"], jnp.float32)
    H = W_h.shape[0]
    ident = (W_in.shape[0] == W_in.shape[1]) and bool(
        jnp.array_equal(W_in, jnp.eye(W_in.shape[0], dtype=W_in.dtype)))
    return {
        "W_h": W_h.astype(matmul_dtype),        # (H, H)    lane-dense layout LHS
        "W_h_T": W_h.T.astype(matmul_dtype),    # (H, H)    batch-major layout RHS
        "W_in": W_in.astype(matmul_dtype),      # (H, D_in)
        "W_in_T": W_in.T.astype(matmul_dtype),  # (D_in, H)
        "b_h_col": jnp.asarray(params["b_h"], jnp.float32).reshape(H, 1),
        "b_h_row": jnp.asarray(params["b_h"], jnp.float32).reshape(1, H),
        "scalar": float(jnp.asarray(params["scalar"]).reshape(())),  # frozen 20.0
        "w_in_identity": ident,
    }


def _round_up(n, m):
    return ((n + m - 1) // m) * m


def repeated_layers_forward(initial_hidden, x, prep, *, layers: int,
                            tile_b=None, chains=None):
    """initial_hidden: (B, H) or (H,); x: (B, D_in). Returns u: (B, H)."""
    B, D_in = x.shape
    H = prep["W_h"].shape[0]
    out_dtype = initial_hidden.dtype

    if initial_hidden.ndim == 1:
        initial_hidden = jnp.broadcast_to(initial_hidden[None, :], (B, H))

    has_win = not prep["w_in_identity"]
    transposed = (H % 128 != 0)              # lane-dense layout when H under-fills lanes
    quant = 128 if transposed else 8         # batch-tile quantum (lanes vs sublanes)

    # --- tile selection: big tiles, but >= 2 grid steps so both v7x TCs get work.
    b_q = _round_up(B, quant)
    if tile_b is None:
        if b_q >= 2 * quant:
            tile_b = min(1024 if transposed else 512,
                         max(quant, (b_q // 2) // quant * quant))
        else:
            tile_b = quant
    tile_b = max(quant, _round_up(tile_b, quant))

    # --- VMEM budget: weights (+bias) + double-buffered u0/x/y tiles; shrink if needed.
    w_bytes = prep["W_h"].size * prep["W_h"].dtype.itemsize + prep["b_h_col"].size * 4
    if has_win:
        w_bytes += prep["W_in"].size * prep["W_in"].dtype.itemsize

    def _need(tb):
        io = (H * tb + D_in * tb + H * tb) * 4          # u0 / x / y tiles, f32
        return 2 * w_bytes + 2 * io                     # everything double-buffered

    VMEM_CAP = 48 << 20                                 # fits v5e/v6e/v7x physical VMEM
    while tile_b > quant and _need(tile_b) > VMEM_CAP:
        tile_b = max(quant, (tile_b // 2) // quant * quant)
    vmem_limit = int(min(max(_need(tile_b) + (2 << 20), 32 << 20), VMEM_CAP))

    if chains is None:
        chains = 2 if tile_b % (2 * quant) == 0 else 1
    assert tile_b % (chains * quant) == 0, "tile_b must be a multiple of chains*quantum"

    B_pad = _round_up(B, tile_b)

    if transposed:
        u0 = initial_hidden.T                            # (H, B): batch on lanes
        xt = x.T                                         # (D_in, B)
        if B_pad != B:
            u0 = jnp.pad(u0, ((0, 0), (0, B_pad - B)))
            xt = jnp.pad(xt, ((0, 0), (0, B_pad - B)))
        arrays = [u0, xt, prep["W_h"]] + ([prep["W_in"]] if has_win else []) + [prep["b_h_col"]]
        in_specs = (
            [pl.BlockSpec((H, tile_b), lambda i: (0, i)),        # u0^T tile
             pl.BlockSpec((D_in, tile_b), lambda i: (0, i)),     # x^T tile
             pl.BlockSpec((H, H), lambda i: (0, 0))]             # W_h (resident)
            + ([pl.BlockSpec((H, D_in), lambda i: (0, 0))] if has_win else [])
            + [pl.BlockSpec((H, 1), lambda i: (0, 0))])          # b_h column (resident)
        out_shape = jax.ShapeDtypeStruct((H, B_pad), out_dtype)
        out_spec = pl.BlockSpec((H, tile_b), lambda i: (0, i))   # lane-dense stores
    else:
        u0, xp = initial_hidden, x
        if B_pad != B:
            u0 = jnp.pad(u0, ((0, B_pad - B), (0, 0)))
            xp = jnp.pad(xp, ((0, B_pad - B), (0, 0)))
        arrays = [u0, xp, prep["W_h_T"]] + ([prep["W_in_T"]] if has_win else []) + [prep["b_h_row"]]
        in_specs = (
            [pl.BlockSpec((tile_b, H), lambda i: (i, 0)),
             pl.BlockSpec((tile_b, D_in), lambda i: (i, 0)),
             pl.BlockSpec((H, H), lambda i: (0, 0))]
            + ([pl.BlockSpec((D_in, H), lambda i: (0, 0))] if has_win else [])
            + [pl.BlockSpec((1, H), lambda i: (0, 0))])
        out_shape = jax.ShapeDtypeStruct((B_pad, H), out_dtype)
        out_spec = pl.BlockSpec((tile_b, H), lambda i: (i, 0))

    kernel = functools.partial(_repeated_kernel, layers=layers, chains=chains,
                               scale=prep["scalar"], has_win=has_win,
                               transposed=transposed)

    y = pl.pallas_call(
        kernel,
        out_shape=out_shape,
        grid=(B_pad // tile_b,),
        in_specs=in_specs,
        out_specs=out_spec,
        compiler_params=pltpu.CompilerParams(
            dimension_semantics=("parallel",),          # batch axis -> both v7x TCs
            vmem_limit_bytes=vmem_limit),
    )(*arrays)

    return (y[:, :B].T if transposed else y[:B])


def _reference_forward(initial_hidden, x, params, *, layers: int):
    """Pure-JAX mirror of the PyTorch module's forward (f32, HIGHEST-precision dots)."""
    hi = lax.Precision.HIGHEST
    u = initial_hidden
    if u.ndim == 1:
        u = jnp.broadcast_to(u[None, :], (x.shape[0], u.shape[0]))
    W_hT, W_inT = params["W_h"].T, params["W_in"].T
    for _ in range(layers):
        v = jnp.dot(u, W_hT, precision=hi) + params["b_h"] + jnp.dot(x, W_inT, precision=hi)
        u = jnp.tanh(v * params["scalar"])
    return u


def init_params(key, D_in, H):
    """Mirror the module's fixed, masked construction (all params frozen)."""
    assert D_in == H, "diagMask construction implies D_input == hidden"
    weight_mask = jax.random.bernoulli(key, 0.3, (H, H))                # connectivity mask
    diag_mask = jnp.eye(H, dtype=bool)
    return {
        "W_h": jnp.where(weight_mask, 0.25, 0.0).astype(jnp.float32),   # hiddenWeight.weight
        "b_h": jnp.full((H,), -0.15, jnp.float32),                      # hiddenWeight.bias
        "W_in": jnp.where(diag_mask, 1.0, 0.0).astype(jnp.float32),     # inputWeight.weight
        "scalar": jnp.array([20.0], jnp.float32),                       # fixed scale
    }


if __name__ == "__main__":
    B, H, LAYERS = 512, 32, 4
    D_IN = H                 # diagMask in the module requires D_input == hidden

    key = jax.random.PRNGKey(0)
    ku, kx, kp = jax.random.split(key, 3)
    initial_hidden = jax.random.normal(ku, (B, H), jnp.float32)
    x = jax.random.normal(kx, (B, D_IN), jnp.float32)
    params = init_params(kp, D_IN, H)

    prep = prepare_params(params)   # one-time transposes / identity detection, f32 weights
    # auto tile: 256 lanes per step -> grid of 2 ("parallel" -> both v7x TCs), 2 chains
    y = repeated_layers_forward(initial_hidden, x, prep, layers=LAYERS)
    y = jax.block_until_ready(y)

    y_ref = _reference_forward(initial_hidden, x, params, layers=LAYERS)
    assert y.shape == (B, H)
    # tanh(20*v) dynamics amplify benign matmul rounding differences (pass order /
    # MXU emulation) by orders of magnitude; outputs are bounded in [-1, 1], so a
    # 1e-2 absolute check is the right-sized correctness test for this module.
    assert jnp.allclose(y, y_ref, atol=1e-2, rtol=0.0), "mismatch vs reference"

    print("KERNEL_OK")
</pallas_src>

<mosaic_0001>
module attributes {stable_mosaic.version = 11 : i64} {
  func.func @_repeated_kernel(%arg0: i32, %arg1: memref<32x256xf32, #tpu.memory_space<vmem>>, %arg2: memref<32x256xf32, #tpu.memory_space<vmem>>, %arg3: memref<32x32xf32, #tpu.memory_space<vmem>>, %arg4: memref<32x1xf32, #tpu.memory_space<vmem>>, %arg5: memref<32x256xf32, #tpu.memory_space<vmem>>) attributes {dimension_semantics = [#tpu.dimension_semantics<parallel>], iteration_bounds = array<i64: 2>, scalar_prefetch = 0 : i64, scratch_operands = 0 : i64, tpu.core_type = #tpu.core_type<tc>, window_params = [{transform_indices = @transform_0, window_bounds = array<i64: 32, 256>}, {transform_indices = @transform_1, window_bounds = array<i64: 32, 256>}, {pipeline_mode = #tpu.pipeline_mode<synchronous>, transform_indices = @transform_2, window_bounds = array<i64: 32, 32>}, {pipeline_mode = #tpu.pipeline_mode<synchronous>, transform_indices = @transform_3, window_bounds = array<i64: 32, 1>}, {transform_indices = @transform_4, window_bounds = array<i64: 32, 256>}]} {
    %c0 = arith.constant 0 : index
    %c0_0 = arith.constant 0 : index
    %0 = vector.load %arg3[%c0, %c0_0] : memref<32x32xf32, #tpu.memory_space<vmem>>, vector<32x32xf32>
    %c0_1 = arith.constant 0 : index
    %c0_2 = arith.constant 0 : index
    %1 = vector.load %arg4[%c0_1, %c0_2] : memref<32x1xf32, #tpu.memory_space<vmem>>, vector<32x1xf32>
    %2 = vector.shape_cast %1 : vector<32x1xf32> to vector<32x1xf32>
    %3 = vector.broadcast %2 : vector<32x1xf32> to vector<32x128xf32>
    %c0_3 = arith.constant 0 : index
    %c0_4 = arith.constant 0 : index
    %4 = vector.load %arg2[%c0_3, %c0_4] : memref<32x256xf32, #tpu.memory_space<vmem>>, vector<32x256xf32>
    %c0_5 = arith.constant 0 : index
    %c0_6 = arith.constant 0 : index
    %5 = vector.load %arg1[%c0_5, %c0_6] : memref<32x256xf32, #tpu.memory_space<vmem>>, vector<32x128xf32>
    %c0_7 = arith.constant 0 : index
    %c128 = arith.constant 128 : index
    %6 = vector.load %arg1[%c0_7, %c128] : memref<32x256xf32, #tpu.memory_space<vmem>>, vector<32x128xf32>
    %7 = vector.extract_strided_slice %4 {offsets = [0, 0], sizes = [32, 128], strides = [1, 1]} : vector<32x256xf32> to vector<32x128xf32>
    %8 = vector.extract_strided_slice %4 {offsets = [0, 128], sizes = [32, 128], strides = [1, 1]} : vector<32x256xf32> to vector<32x128xf32>
    %c0_i32 = arith.constant 0 : i32
    %cst = arith.constant dense<0.000000e+00> : vector<32x128xf32>
    %9 = tpu.matmul %0, %5, %cst {dimension_numbers = #tpu.dot_dimension_numbers<[1], [0], [0], [1], [0, 0, 1, 1], [], []>} : vector<32x32xf32>, vector<32x128xf32>, vector<32x128xf32> -> vector<32x128xf32>
    %10 = arith.addf %9, %3 : vector<32x128xf32>
    %11 = arith.addf %10, %7 : vector<32x128xf32>
    %cst_8 = arith.constant 2.000000e+01 : f32
    %12 = vector.broadcast %cst_8 : f32 to vector<32x128xf32>
    %13 = arith.mulf %11, %12 : vector<32x128xf32>
    %14 = math.tanh %13 : vector<32x128xf32>
    %cst_9 = arith.constant dense<0.000000e+00> : vector<32x128xf32>
    %15 = tpu.matmul %0, %6, %cst_9 {dimension_numbers = #tpu.dot_dimension_numbers<[1], [0], [0], [1], [0, 0, 1, 1], [], []>} : vector<32x32xf32>, vector<32x128xf32>, vector<32x128xf32> -> vector<32x128xf32>
    %16 = arith.addf %15, %3 : vector<32x128xf32>
    %17 = arith.addf %16, %8 : vector<32x128xf32>
    %cst_10 = arith.constant 2.000000e+01 : f32
    %18 = vector.broadcast %cst_10 : f32 to vector<32x128xf32>
    %19 = arith.mulf %17, %18 : vector<32x128xf32>
    %20 = math.tanh %19 : vector<32x128xf32>
    %c1_i32 = arith.constant 1 : i32
    %cst_11 = arith.constant dense<0.000000e+00> : vector<32x128xf32>
    %21 = tpu.matmul %0, %14, %cst_11 {dimension_numbers = #tpu.dot_dimension_numbers<[1], [0], [0], [1], [0, 0, 1, 1], [], []>} : vector<32x32xf32>, vector<32x128xf32>, vector<32x128xf32> -> vector<32x128xf32>
    %22 = arith.addf %21, %3 : vector<32x128xf32>
    %23 = arith.addf %22, %7 : vector<32x128xf32>
    %cst_12 = arith.constant 2.000000e+01 : f32
    %24 = vector.broadcast %cst_12 : f32 to vector<32x128xf32>
    %25 = arith.mulf %23, %24 : vector<32x128xf32>
    %26 = math.tanh %25 : vector<32x128xf32>
    %cst_13 = arith.constant dense<0.000000e+00> : vector<32x128xf32>
    %27 = tpu.matmul %0, %20, %cst_13 {dimension_numbers = #tpu.dot_dimension_numbers<[1], [0], [0], [1], [0, 0, 1, 1], [], []>} : vector<32x32xf32>, vector<32x128xf32>, vector<32x128xf32> -> vector<32x128xf32>
    %28 = arith.addf %27, %3 : vector<32x128xf32>
    %29 = arith.addf %28, %8 : vector<32x128xf32>
    %cst_14 = arith.constant 2.000000e+01 : f32
    %30 = vector.broadcast %cst_14 : f32 to vector<32x128xf32>
    %31 = arith.mulf %29, %30 : vector<32x128xf32>
    %32 = math.tanh %31 : vector<32x128xf32>
    %c2_i32 = arith.constant 2 : i32
    %cst_15 = arith.constant dense<0.000000e+00> : vector<32x128xf32>
    %33 = tpu.matmul %0, %26, %cst_15 {dimension_numbers = #tpu.dot_dimension_numbers<[1], [0], [0], [1], [0, 0, 1, 1], [], []>} : vector<32x32xf32>, vector<32x128xf32>, vector<32x128xf32> -> vector<32x128xf32>
    %34 = arith.addf %33, %3 : vector<32x128xf32>
    %35 = arith.addf %34, %7 : vector<32x128xf32>
    %cst_16 = arith.constant 2.000000e+01 : f32
    %36 = vector.broadcast %cst_16 : f32 to vector<32x128xf32>
    %37 = arith.mulf %35, %36 : vector<32x128xf32>
    %38 = math.tanh %37 : vector<32x128xf32>
    %cst_17 = arith.constant dense<0.000000e+00> : vector<32x128xf32>
    %39 = tpu.matmul %0, %32, %cst_17 {dimension_numbers = #tpu.dot_dimension_numbers<[1], [0], [0], [1], [0, 0, 1, 1], [], []>} : vector<32x32xf32>, vector<32x128xf32>, vector<32x128xf32> -> vector<32x128xf32>
    %40 = arith.addf %39, %3 : vector<32x128xf32>
    %41 = arith.addf %40, %8 : vector<32x128xf32>
    %cst_18 = arith.constant 2.000000e+01 : f32
    %42 = vector.broadcast %cst_18 : f32 to vector<32x128xf32>
    %43 = arith.mulf %41, %42 : vector<32x128xf32>
    %44 = math.tanh %43 : vector<32x128xf32>
    %c3_i32 = arith.constant 3 : i32
    %cst_19 = arith.constant dense<0.000000e+00> : vector<32x128xf32>
    %45 = tpu.matmul %0, %38, %cst_19 {dimension_numbers = #tpu.dot_dimension_numbers<[1], [0], [0], [1], [0, 0, 1, 1], [], []>} : vector<32x32xf32>, vector<32x128xf32>, vector<32x128xf32> -> vector<32x128xf32>
    %46 = arith.addf %45, %3 : vector<32x128xf32>
    %47 = arith.addf %46, %7 : vector<32x128xf32>
    %cst_20 = arith.constant 2.000000e+01 : f32
    %48 = vector.broadcast %cst_20 : f32 to vector<32x128xf32>
    %49 = arith.mulf %47, %48 : vector<32x128xf32>
    %50 = math.tanh %49 : vector<32x128xf32>
    %cst_21 = arith.constant dense<0.000000e+00> : vector<32x128xf32>
    %51 = tpu.matmul %0, %44, %cst_21 {dimension_numbers = #tpu.dot_dimension_numbers<[1], [0], [0], [1], [0, 0, 1, 1], [], []>} : vector<32x32xf32>, vector<32x128xf32>, vector<32x128xf32> -> vector<32x128xf32>
    %52 = arith.addf %51, %3 : vector<32x128xf32>
    %53 = arith.addf %52, %8 : vector<32x128xf32>
    %cst_22 = arith.constant 2.000000e+01 : f32
    %54 = vector.broadcast %cst_22 : f32 to vector<32x128xf32>
    %55 = arith.mulf %53, %54 : vector<32x128xf32>
    %56 = math.tanh %55 : vector<32x128xf32>
    %c0_23 = arith.constant 0 : index
    %c0_24 = arith.constant 0 : index
    %57 = vector.load %arg5[%c0_23, %c0_24] : memref<32x256xf32, #tpu.memory_space<vmem>>, vector<32x128xf32>
    tpu.vector_store %arg5[%c0_23, %c0_24], %50 {strides = array<i32>} : memref<32x256xf32, #tpu.memory_space<vmem>>, vector<32x128xf32>,
    %c0_25 = arith.constant 0 : index
    %c128_26 = arith.constant 128 : index
    %58 = vector.load %arg5[%c0_25, %c128_26] : memref<32x256xf32, #tpu.memory_space<vmem>>, vector<32x128xf32>
    tpu.vector_store %arg5[%c0_25, %c128_26], %56 {strides = array<i32>} : memref<32x256xf32, #tpu.memory_space<vmem>>, vector<32x128xf32>,
    return
  }
  func.func @transform_0(%arg0: i32) -> (i32, i32) {
    %c0_i32 = arith.constant 0 : i32
    %c0_i32_0 = arith.constant 0 : i32
    return %c0_i32, %arg0 : i32, i32
  }
  func.func @transform_1(%arg0: i32) -> (i32, i32) {
    %c0_i32 = arith.constant 0 : i32
    %c0_i32_0 = arith.constant 0 : i32
    return %c0_i32, %arg0 : i32, i32
  }
  func.func @transform_2(%arg0: i32) -> (i32, i32) {
    %c0_i32 = arith.constant 0 : i32
    %c0_i32_0 = arith.constant 0 : i32
    %c0_i32_1 = arith.constant 0 : i32
    return %c0_i32, %c0_i32_0 : i32, i32
  }
  func.func @transform_3(%arg0: i32) -> (i32, i32) {
    %c0_i32 = arith.constant 0 : i32
    %c0_i32_0 = arith.constant 0 : i32
    %c0_i32_1 = arith.constant 0 : i32
    return %c0_i32, %c0_i32_0 : i32, i32
  }
  func.func @transform_4(%arg0: i32) -> (i32, i32) {
    %c0_i32 = arith.constant 0 : i32
    %c0_i32_0 = arith.constant 0 : i32
    return %c0_i32, %arg0 : i32, i32
  }
}

</mosaic_0001>

<bundles_post_ra>
// kernel: tpu_custom_call.1
= control target key start
LH: loop header
LB: loop body
LE: loop exit
PB: predicated region body
PF: predicated region fallthrough
CT: control target
= control target key end

     0   :  { %s1487_s0 = inlined_call_operand.hbm [shape: f32[32,512], index: 0, kind: input, shape index: {}]   ;;  %s1488_s1 = inlined_call_operand.hbm [shape: f32[32,512], index: 1, kind: input, shape index: {}]   ;;  %s1489_s2 = inlined_call_operand.vmem [shape: f32[32,32], index: 2, kind: input, shape index: {}]   ;;  %s1490_s3 = inlined_call_operand.vmem [shape: f32[32,1], index: 3, kind: input, shape index: {}]   ;;  %s1491_s4 = inlined_call_operand.hbm [shape: f32[32,512], index: 4, kind: output, shape index: {}]  }
   0x1   :  { %1494 = sst [smem:[#allocation13_spill]] %s1487_s0 }
   0x2   :  { %9 = vsyncpa [#allocation3], 0 }
   0x3   :  { %11 = vsyncpa [#allocation3 + $0x1], 0 }
   0x4   :  { %12 = vsyncpa [#allocation6], 0 }
   0x5   :  { %14 = vsyncpa [#allocation6 + $0x1], 0 }
   0x6   :  { %15 = vsyncpa [#allocation4], 0 }
   0x7   :  { %17 = vsyncpa [#allocation4 + $0x1], 0  ;;  %s1109_s15 = smov 0   ;;  %s1111_s16 = smov 0  }
   0x8   :  { %s1113_s17 = smov 0   ;;  %s1115_s18 = smov 0  }
   0x9 LB: > { %1495 = sst [smem:[#allocation11_spill]] %s1071_s17  ;;  %s1130_s19 = sadd.s32 4294967295, %s1075_s18   ;;  %s1075_s18 = sphi %s1115_s18, %s1509_s18   ;;  %s1071_s17 = sphi %s1113_s17, %s1506_s17   ;;  %s1067_s16 = sphi %s1111_s16, %s1508_s16   ;;  %s1063_s15 = sphi %s1109_s15, %s1507_s15  }
   0xa   : > { %s768_s20 = sadd.s32 4294967294, %s1075_s18   ;;  %s1134_s21 = sadd.s32 1, %s1075_s18  }
   0xb   : > { %s30_s22 = sadd.s32 1, %s1071_s17  ;;  %s27_s23 = ssub.s32 %s1075_s18, %s1134_s21 }
   0xc   : > { %p37_p0 = scmp.ne.s32.totalorder %s1071_s17, %s1067_s16  ;;  %p28_p1 = scmp.eq.s32.totalorder %s27_s23, 0 }
   0xd   : > { %p38_p2 = scmp.eq.s32.totalorder %s1075_s18, 0  ;;  %p43_p3 = scmp.ne.s32.totalorder %s1067_s16, %s1063_s15 }
   0xe   : > { %p44_p4 = scmp.eq.s32.totalorder %s1130_s19, 0  ;;  %p135_p7 = scmp.eq.s32.totalorder %s1130_s19, 1 }
   0xf   : > { %s1146_s24 = scalar_select %p28_p1, %s1071_s17, %s30_s22  }
  0x10   : > { %p1148_p5 = por %p38_p2, %p37_p0  ;;  %p1152_p6 = por %p44_p4, %p43_p3 }
  0x11   : > { %1496 = sst [smem:[#allocation12_spill]] %s1146_s24  ;;  %p141_p8 = scmp.eq.s32.totalorder %s768_s20, 1 }
  0x12   : > { %p770_p9 = scmp.ge.s32.totalorder %s1075_s18, 2  ;;  %p838_p10 = scmp.lt.s32.totalorder %s1075_s18, 2 }
  0x13   : > { %p1159_p11 = por %p135_p7, %p37_p0  ;;  %p1163_p12 = por %p141_p8, %p43_p3 }
  0x14   : > { %s1168_s29 = sand.u32 1, %s1071_s17   ;;  %s818_s30 = sshll.u32 %s1075_s18, 4 }
  0x15   : > { %s1492_s5 = sshll.u32 %s1168_s29, 6  ;;  %s1501_s0 = sld [smem:[#allocation13_spill]] }
  0x16   : > { %s171_s10 = scalar_lea.vmem [#allocation2], %s1492_s5  ;;  %p1181_p13 = pnand %p838_p10, %p1148_p5 }
  0x17   : > { %s179_s11 = sshll.u32 %s171_s10, 4  ;;  %p777_p0 = scmp.ge.s32.totalorder %s1075_s18, 1  ;;  %s180_s11 = int_to_ptr.vmem [resolvable:$true] %s179_s11 }
  0x18   : > { %s168_s13 = scalar_lea.sflag [#allocation3], %s1168_s29  ;;  %p949_p2 = pneg %p1181_p13 }
  0x1b   : > { %s176_s8 = scalar_lea.hbm %s1501_s0, %s818_s30  ;;  %s952_s25 = scalar_lea.hbm %s1501_s0, 128 }
  0x1c   : > { %s177_s9 = sshll.u32 %s176_s8, 4  ;;  %s178_s9 = int_to_ptr.hbm [resolvable:$true] %s177_s9 }
  0x1d   : > { %s945_s14 = sshra.s32 %s178_s9, 4  ;;  %s946_s14 = int_to_ptr.hbm [resolvable:$true] %s945_s14 }
  0x1e   : > { %s947_s20 = scalar_lea.hbm %s946_s14, 64  ;;  %p953_p5 = scmp.lt.s32.totalorder %s946_s14, %s1501_s0 }
  0x1f   : > { %p948_p1 = scmp.ne.s32.totalorder %s946_s14, %s947_s20  ;;  %p954_p7 = scmp.lt.s32.totalorder %s952_s25, %s947_s20 }
  0x21   : > { %p950_p3 = pnand %p949_p2, %p948_p1  ;;  %p955_p8 = por %p954_p7, %p953_p5 }
  0x23   : > { %p951_p4 = pneg %p950_p3 }
  0x25   : > { %p956_p10 = pnand %p955_p8, %p951_p4 }
  0x27   : > { %959 = shalt.err (!%p956_p10)
}
  0x28   : > { %s1077_s8 = smov 512   ;;  %s1078_s10 = smov 256  }
  0x29   : > { %s1079_s5 = smov 16   ;;  %p209_p1 = scmp.lt.s32.totalorder %s1075_s18, 3 }
  0x2a   : > { %830 = dma.hbm_to_vmem [thread:$0]  (!%p1181_p13), %s178_s9, 1024, %s180_s11, %s168_s13, %s1077_s8, %s1078_s10, %s1079_s5  }
  0x2b   : > { %s198_s22 = scalar_lea.hbm %s1488_s1, %s818_s30  ;;  %p1209_p3 = pnand %p777_p0, %p209_p1 }
  0x2c   : > { %s199_s25 = sshll.u32 %s198_s22, 4  ;;  %s1504_s6 = sshll.u32 %s1168_s29, 6  ;;  %s200_s25 = int_to_ptr.hbm [resolvable:$true] %s199_s25 }
  0x2d   : > { %s193_s7 = scalar_lea.vmem [#allocation5], %s1504_s6  ;;  %s190_s24 = scalar_lea.sflag [#allocation6], %s1168_s29 }
  0x2e   : > { %s201_s0 = sshll.u32 %s193_s7, 4  ;;  %s975_s17 = sshra.s32 %s200_s25, 4  ;;  %s202_s0 = int_to_ptr.vmem [resolvable:$true] %s201_s0  ;;  %s976_s17 = int_to_ptr.hbm [resolvable:$true] %s975_s17 }
  0x2f   : > { %s977_s9 = scalar_lea.hbm %s976_s17, 64  ;;  %s982_s13 = scalar_lea.hbm %s1488_s1, 128 }
  0x30   : > { %p978_p4 = scmp.ne.s32.totalorder %s976_s17, %s977_s9  ;;  %p983_p0 = scmp.lt.s32.totalorder %s976_s17, %s1488_s1 }
  0x31   : > { %p984_p8 = scmp.lt.s32.totalorder %s982_s13, %s977_s9 }
  0x32   : > { %p980_p5 = pnand %p978_p4, %p949_p2 }
  0x33   : > { %p985_p10 = por %p984_p8, %p983_p0 }
  0x34   : > { %p981_p7 = pneg %p980_p5 }
  0x36   : > { %p986_p1 = pnand %p985_p10, %p981_p7 }
  0x38   : > { %989 = shalt.err (!%p986_p1)
}
  0x39   : > { %833 = dma.hbm_to_vmem [thread:$0]  (!%p1181_p13), %s200_s25, 1024, %s202_s0, %s190_s24, %s1077_s8, %s1078_s10, %s1079_s5  }
  0x3a   : > { %213 = sbr.rel (%p1209_p3) target bundleno = 766 (0x2fe), region = 36  ;;  %s1231_s29 = sand.u32 (!%p1209_p3), 1, %s1067_s16  }
  0x3b   : > { %s1234_s22 = sshll.u32 (!%p1209_p3), %s1231_s29, 6  ;;  %s216_s17 = scalar_lea.sflag (!%p1209_p3), [#allocation3], %s1231_s29 }
  0x3c   : > { %s219_s6 = scalar_lea.vmem (!%p1209_p3), [#allocation2], %s1234_s22 }
  0x3f   : > { %1050 = dma.done.wait (%p1152_p6), %s216_s17, 1024  }
  0x40   : > { %1052 = vsyncadd (%p1152_p6), %s216_s17, 4294966272  ;;  %s226_s0 = scalar_lea.sflag [#allocation6], %s1231_s29  ;;  %s1244_s24 = scalar_lea.vmem [#allocation5], %s1234_s22 }
  0x41   : > { %1054 = dma.done.wait (%p1152_p6), %s226_s0, 1024  }
  0x42   : > { %1056 = vsyncadd (%p1152_p6), %s226_s0, 4294966272  ;;  %v1080_v0 = vmov 0   ;;  %v302_v1 = vld [vmem:[%s219_s6 + $0x30] sm:$0xff]  ;;  %v306_v2 = vld [vmem:[%s219_s6 + $0x38] sm:$0xff]  ;;  %vm307_vm0 = vcmask 261120   ;;  %s1435_s0 = scalar_lea.vmem [#allocation7], %s1234_s22 }
  0x43   : > { %880 = vset.pattern.permute.xlu1 %v1080_v0  ;;  %879 = vset.pattern.permute.xlu0 %v1080_v0  ;;  %v301_v3 = vld [vmem:[%s219_s6 + $0x20] sm:$0xff]  ;;  %v305_v4 = vld [vmem:[%s219_s6 + $0x28] sm:$0xff]  ;;  %v300_v5 = vld [vmem:[%s219_s6 + $0x10] sm:$0xff]  ;;  %s820_s22 = sshll.u32 %s1130_s19, 4  ;;  %s669_s26 = sshll.u32 %s1435_s0, 4  ;;  %s670_s26 = int_to_ptr.vmem [resolvable:$true] %s669_s26 }
  0x44   : > { %332 = vmatpush.msra.mxu0 %v302_v1  ;;  %373 = vmatpush.msra.mxu1 %v306_v2  ;;  %v304_v6 = vld [vmem:[%s219_s6 + $0x18] sm:$0xff]  ;;  %v268_v7 = vld [vmem:[%s1490_s3 + $0x8] sm:$0xff]  ;;  %v299_v8 = vld [vmem:[%s219_s6] sm:$0xff]  ;;  %s668_s12 = scalar_lea.hbm %s1491_s4, %s820_s22  ;;  %s657_s8 = scalar_lea.sflag [#allocation4], %s1231_s29 }
  0x45   : > { %v303_v9 = vld [vmem:[%s219_s6 + $0x8] sm:$0xff]  ;;  %278 = vperm.xlu1 %880, %v268_v7   ;;  %v270_v10 = vld [vmem:[%s1490_s3 + $0x18] sm:$0xff]  ;;  %v1259_v11 = vld [vmem:[%s1489_s2] sm:$0xff]  ;;  %s671_s19 = sshll.u32 %s668_s12, 4  ;;  %s1025_s9 = scalar_lea.hbm %s1491_s4, 128  ;;  %s672_s19 = int_to_ptr.hbm [resolvable:$true] %s671_s19 }
  0x46   : > { %333 = vmatpush.msra.mxu0 %v301_v3  ;;  %374 = vmatpush.msra.mxu1 %v305_v4  ;;  %v267_v12 = vld [vmem:[%s1490_s3] sm:$0xff]  ;;  %v269_v13 = vld [vmem:[%s1490_s3 + $0x10] sm:$0xff]  ;;  %v1274_v14 = vld [vmem:[%s1489_s2 + $0x8] sm:$0xff]  ;;  %s1019_s10 = sshra.s32 %s672_s19, 4  ;;  %s1020_s10 = int_to_ptr.hbm [resolvable:$true] %s1019_s10 }
  0x47   : > { %288 = vperm.xlu0 %879, %v270_v10   ;;  %v1283_v15 = vld [vmem:[%s1489_s2 + $0x10] sm:$0xff]  ;;  %v1292_v16 = vld [vmem:[%s1489_s2 + $0x18] sm:$0xff]  ;;  %v1308_v28 = vld [vmem:[%s1244_s24 + $0x20] sm:$0xff]  ;;  %s1021_s23 = scalar_lea.hbm %s1020_s10, 64  ;;  %p1026_p3 = scmp.lt.s32.totalorder %s1020_s10, %s1491_s4 }
  0x48   : > { %334 = vmatpush.msra.mxu0 %v300_v5  ;;  %375 = vmatpush.msra.mxu1 %v304_v6  ;;  %v1313_v31 = vld [vmem:[%s1244_s24 + $0x28] sm:$0xff]  ;;  %v1316_v32 = vld [vmem:[%s1244_s24 + $0x10] sm:$0xff]  ;;  %v1323_v37 = vld [vmem:[%s1244_s24 + $0x38] sm:$0xff]  ;;  %p1022_p6 = scmp.ne.s32.totalorder %s1020_s10, %s1021_s23  ;;  %p1027_p4 = scmp.lt.s32.totalorder %s1025_s9, %s1021_s23 }
  0x49   : > { %v1320_v36 = vld [vmem:[%s1244_s24 + $0x30] sm:$0xff]  ;;  %v1327_v39 = vld [vmem:[%s1244_s24 + $0x18] sm:$0xff]  ;;  %v1333_v43 = vld [vmem:[%s1244_s24] sm:$0xff] }
  0x4a   : > { %335 = vmatpush.msra.mxu0 %v299_v8  ;;  %376 = vmatpush.msra.mxu1 %v303_v9  ;;  %v1338_v46 = vld [vmem:[%s1244_s24 + $0x8] sm:$0xff]  ;;  %p1023_p13 = pnand %p1022_p6, %p1159_p11  ;;  %p1028_p5 = por %p1027_p4, %p1026_p3 }
  0x4b   : > { %781 = vmatmul.msk.f32.vlgmr.msra.gmra.mxu0 %vm307_vm0, %v1259_v11  ;;  %785 = vmatmul.msk.f32.vlgmr.msra.gmra.mxu1 %vm307_vm0, %v1259_v11 }
  0x4c   : > { %p1024_p2 = pneg %p1023_p13 }
  0x4d   : > { %273 = vperm.xlu1 %880, %v267_v12  }
  0x4e   : > { %p1029_p7 = pnand %p1028_p5, %p1024_p2 }
  0x4f   : > { %283 = vperm.xlu0 %879, %v269_v13  }
  0x53   : > { %782 = vmatmul.msk.f32.gmra.mxu0 %vm307_vm0, %v1274_v14  ;;  %786 = vmatmul.msk.f32.gmra.mxu1 %vm307_vm0, %v1274_v14 }
  0x5b   : > { %783 = vmatmul.msk.f32.gmra.mxu0 %vm307_vm0, %v1283_v15  ;;  %787 = vmatmul.msk.f32.gmra.mxu1 %vm307_vm0, %v1283_v15 }
  0x63   : > { %784 = vmatmul.msk.f32.gmra.mxu0 %vm307_vm0, %v1292_v16  ;;  %788 = vmatmul.msk.f32.gmra.mxu1 %vm307_vm0, %v1292_v16 }
  0xb7   : > { %v1300_v22 = vpop.permute.xlu1 %278 }
  0xb9   : > { %v1298_v19 = vpop.permute.xlu0 %288 }
  0xbf   : > { %v1305_v27 = vpop.permute.xlu1 %273 }
  0xc1   : > { %v1302_v25 = vpop.permute.xlu0 %283 }
  0xc8   : > { %v337_v17 = vpop.f32.mrf.mxu0  ;;  %v378_v18 = vpop.f32.mrf.mxu1 }
  0xc9   : > { %v338_v38 = vadd.f32 %v337_v17, %v1305_v27  ;;  %v379_v44 = vadd.f32 %v378_v18, %v1305_v27 }
  0xcb   : > { %v349_v51 = vadd.f32 %v338_v38, %v1333_v43  ;;  %v390_v55 = vadd.f32 %v379_v44, %v1338_v46 }
  0xcd   : > { %v353_v59 = vmul.f32 20.0, %v349_v51  ;;  %v394_v60 = vmul.f32 20.0, %v390_v55 }
  0xd0   : > { %v340_v20 = vpop.f32.mrf.mxu0  ;;  %v381_v21 = vpop.f32.mrf.mxu1 }
  0xd1   : > { %v341_v30 = vadd.f32 %v340_v20, %v1300_v22  ;;  %v382_v33 = vadd.f32 %v381_v21, %v1300_v22 }
  0xd3   : > { %v350_v47 = vadd.f32 %v341_v30, %v1316_v32  ;;  %v391_v50 = vadd.f32 %v382_v33, %v1327_v39 }
  0xd5   : > { %v354_v57 = vmul.f32 20.0, %v350_v47  ;;  %v395_v58 = vmul.f32 20.0, %v391_v50 }
  0xd8   : > { %v343_v23 = vpop.f32.mrf.mxu0  ;;  %v384_v24 = vpop.f32.mrf.mxu1 }
  0xd9   : > { %v344_v26 = vadd.f32 %v343_v23, %v1302_v25  ;;  %v385_v29 = vadd.f32 %v384_v24, %v1302_v25 }
  0xdb   : > { %v351_v40 = vadd.f32 %v344_v26, %v1308_v28  ;;  %v392_v45 = vadd.f32 %v385_v29, %v1313_v31 }
  0xdd   : > { %v355_v52 = vmul.f32 20.0, %v351_v40  ;;  %v396_v56 = vmul.f32 20.0, %v392_v45 }
  0xe0   : > { %v346_v34 = vpop.f32.mrf.mxu0  ;;  %v387_v35 = vpop.f32.mrf.mxu1 }
  0xe1   : > { %v347_v41 = vadd.f32 %v346_v34, %v1298_v19  ;;  %v388_v42 = vadd.f32 %v387_v35, %v1298_v19 }
  0xe3   : > { %v352_v48 = vadd.f32 %v347_v41, %v1320_v36  ;;  %v393_v49 = vadd.f32 %v388_v42, %v1323_v37 }
  0xe5   : > { %v356_v53 = vmul.f32 20.0, %v352_v48  ;;  %v397_v54 = vmul.f32 20.0, %v393_v49 }
  0xe7   : > { %881 = vtanh.f32 %v356_v53 }
  0xe8   : > { %883 = vtanh.f32 %v397_v54 }
  0xe9   : > { %885 = vtanh.f32 %v355_v52 }
  0xea   : > { %887 = vtanh.f32 %v396_v56 }
  0xeb   : > { %889 = vtanh.f32 %v354_v57 }
  0xec   : > { %891 = vtanh.f32 %v395_v58 }
  0xed   : > { %v882_v61 = vpop.eup %881  ;;  %893 = vtanh.f32 %v353_v59 }
  0xee   : > { %v884_v62 = vpop.eup %883  ;;  %895 = vtanh.f32 %v394_v60  ;;  %414 = vmatpush.msra.mxu2 %v882_v61 }
  0xef   : > { %v886_v63 = vpop.eup %885  ;;  %455 = vmatpush.msra.mxu3 %v884_v62 }
  0xf0   : > { %v888_v0 = vpop.eup %887  ;;  %415 = vmatpush.msra.mxu2 %v886_v63 }
  0xf1   : > { %v890_v1 = vpop.eup %889  ;;  %456 = vmatpush.msra.mxu3 %v888_v0 }
  0xf2   : > { %v892_v2 = vpop.eup %891  ;;  %416 = vmatpush.msra.mxu2 %v890_v1 }
  0xf3   : > { %v894_v3 = vpop.eup %893  ;;  %457 = vmatpush.msra.mxu3 %v892_v2 }
  0xf4   : > { %v896_v4 = vpop.eup %895  ;;  %417 = vmatpush.msra.mxu2 %v894_v3 }
  0xf5   : > { %458 = vmatpush.msra.mxu3 %v896_v4  ;;  %789 = vmatmul.msk.f32.vlgmr.msra.gmra.mxu2 %vm307_vm0, %v1259_v11 }
  0xf6   : > { %793 = vmatmul.msk.f32.vlgmr.msra.gmra.mxu3 %vm307_vm0, %v1259_v11 }
  0xfd   : > { %790 = vmatmul.msk.f32.gmra.mxu2 %vm307_vm0, %v1274_v14 }
  0xfe   : > { %794 = vmatmul.msk.f32.gmra.mxu3 %vm307_vm0, %v1274_v14 }
 0x105   : > { %791 = vmatmul.msk.f32.gmra.mxu2 %vm307_vm0, %v1283_v15 }
 0x106   : > { %795 = vmatmul.msk.f32.gmra.mxu3 %vm307_vm0, %v1283_v15 }
 0x10d   : > { %792 = vmatmul.msk.f32.gmra.mxu2 %vm307_vm0, %v1292_v16 }
 0x10e   : > { %796 = vmatmul.msk.f32.gmra.mxu3 %vm307_vm0, %v1292_v16 }
 0x178   : > { %v419_v5 = vpop.f32.mrf.mxu2 }
 0x179   : > { %v460_v6 = vpop.f32.mrf.mxu3  ;;  %v420_v21 = vadd.f32 %v419_v5, %v1305_v27 }
 0x17a   : > { %v461_v29 = vadd.f32 %v460_v6, %v1305_v27 }
 0x17b   : > { %v431_v41 = vadd.f32 %v420_v21, %v1333_v43 }
 0x17c   : > { %v472_v45 = vadd.f32 %v461_v29, %v1338_v46 }
 0x17d   : > { %v435_v51 = vmul.f32 20.0, %v431_v41 }
 0x17e   : > { %v476_v52 = vmul.f32 20.0, %v472_v45 }
 0x180   : > { %v422_v7 = vpop.f32.mrf.mxu2 }
 0x181   : > { %v463_v8 = vpop.f32.mrf.mxu3  ;;  %v423_v17 = vadd.f32 %v422_v7, %v1300_v22 }
 0x182   : > { %v464_v18 = vadd.f32 %v463_v8, %v1300_v22 }
 0x183   : > { %v432_v34 = vadd.f32 %v423_v17, %v1316_v32 }
 0x184   : > { %v473_v38 = vadd.f32 %v464_v18, %v1327_v39 }
 0x185   : > { %v436_v49 = vmul.f32 20.0, %v432_v34 }
 0x186   : > { %v477_v50 = vmul.f32 20.0, %v473_v38 }
 0x188   : > { %v425_v9 = vpop.f32.mrf.mxu2 }
 0x189   : > { %v466_v10 = vpop.f32.mrf.mxu3  ;;  %v426_v12 = vadd.f32 %v425_v9, %v1302_v25 }
 0x18a   : > { %v467_v13 = vadd.f32 %v466_v10, %v1302_v25 }
 0x18b   : > { %v433_v23 = vadd.f32 %v426_v12, %v1308_v28 }
 0x18c   : > { %v474_v30 = vadd.f32 %v467_v13, %v1313_v31 }
 0x18d   : > { %v437_v42 = vmul.f32 20.0, %v433_v23 }
 0x18e   : > { %v478_v47 = vmul.f32 20.0, %v474_v30 }
 0x190   : > { %v428_v20 = vpop.f32.mrf.mxu2 }
 0x191   : > { %v429_v24 = vadd.f32 %v428_v20, %v1298_v19  ;;  %v469_v26 = vpop.f32.mrf.mxu3 }
 0x192   : > { %v470_v33 = vadd.f32 %v469_v26, %v1298_v19 }
 0x193   : > { %v434_v35 = vadd.f32 %v429_v24, %v1320_v36 }
 0x194   : > { %v475_v40 = vadd.f32 %v470_v33, %v1323_v37 }
 0x195   : > { %v438_v44 = vmul.f32 20.0, %v434_v35 }
 0x196   : > { %v479_v48 = vmul.f32 20.0, %v475_v40 }
 0x197   : > { %897 = vtanh.f32 %v438_v44 }
 0x198   : > { %899 = vtanh.f32 %v479_v48 }
 0x199   : > { %901 = vtanh.f32 %v437_v42 }
 0x19a   : > { %903 = vtanh.f32 %v478_v47 }
 0x19b   : > { %905 = vtanh.f32 %v436_v49 }
 0x19c   : > { %907 = vtanh.f32 %v477_v50 }
 0x19d   : > { %v898_v53 = vpop.eup %897  ;;  %909 = vtanh.f32 %v435_v51 }
 0x19e   : > { %v900_v54 = vpop.eup %899  ;;  %911 = vtanh.f32 %v476_v52  ;;  %496 = vmatpush.msrb.mxu0 %v898_v53 }
 0x19f   : > { %v902_v55 = vpop.eup %901  ;;  %537 = vmatpush.msrb.mxu1 %v900_v54 }
 0x1a0   : > { %v904_v56 = vpop.eup %903  ;;  %497 = vmatpush.msrb.mxu0 %v902_v55 }
 0x1a1   : > { %v906_v57 = vpop.eup %905  ;;  %538 = vmatpush.msrb.mxu1 %v904_v56 }
 0x1a2   : > { %v908_v58 = vpop.eup %907  ;;  %498 = vmatpush.msrb.mxu0 %v906_v57 }
 0x1a3   : > { %v910_v59 = vpop.eup %909  ;;  %539 = vmatpush.msrb.mxu1 %v908_v58 }
 0x1a4   : > { %v912_v60 = vpop.eup %911  ;;  %499 = vmatpush.msrb.mxu0 %v910_v59 }
 0x1a5   : > { %540 = vmatpush.msrb.mxu1 %v912_v60  ;;  %797 = vmatmul.msk.f32.vlgmr.msrb.gmra.mxu0 %vm307_vm0, %v1259_v11 }
 0x1a6   : > { %801 = vmatmul.msk.f32.vlgmr.msrb.gmra.mxu1 %vm307_vm0, %v1259_v11 }
 0x1ad   : > { %798 = vmatmul.msk.f32.gmra.mxu0 %vm307_vm0, %v1274_v14 }
 0x1ae   : > { %802 = vmatmul.msk.f32.gmra.mxu1 %vm307_vm0, %v1274_v14 }
 0x1b5   : > { %799 = vmatmul.msk.f32.gmra.mxu0 %vm307_vm0, %v1283_v15 }
 0x1b6   : > { %803 = vmatmul.msk.f32.gmra.mxu1 %vm307_vm0, %v1283_v15 }
 0x1bd   : > { %800 = vmatmul.msk.f32.gmra.mxu0 %vm307_vm0, %v1292_v16 }
 0x1be   : > { %804 = vmatmul.msk.f32.gmra.mxu1 %vm307_vm0, %v1292_v16 }
 0x222   : > { %v501_v61 = vpop.f32.mrf.mxu0 }
 0x223   : > { %v542_v62 = vpop.f32.mrf.mxu1  ;;  %v502_v8 = vadd.f32 %v501_v61, %v1305_v27 }
 0x224   : > { %v543_v13 = vadd.f32 %v542_v62, %v1305_v27 }
 0x225   : > { %v513_v26 = vadd.f32 %v502_v8, %v1333_v43 }
 0x226   : > { %v554_v33 = vadd.f32 %v543_v13, %v1338_v46 }
 0x227   : > { %v517_v41 = vmul.f32 20.0, %v513_v26 }
 0x228   : > { %v558_v42 = vmul.f32 20.0, %v554_v33 }
 0x22a   : > { %v504_v63 = vpop.f32.mrf.mxu0 }
 0x22b   : > { %v545_v0 = vpop.f32.mrf.mxu1  ;;  %v505_v5 = vadd.f32 %v504_v63, %v1300_v22 }
 0x22c   : > { %v546_v6 = vadd.f32 %v545_v0, %v1300_v22 }
 0x22d   : > { %v514_v20 = vadd.f32 %v505_v5, %v1316_v32 }
 0x22e   : > { %v555_v23 = vadd.f32 %v546_v6, %v1327_v39 }
 0x22f   : > { %v518_v38 = vmul.f32 20.0, %v514_v20 }
 0x230   : > { %v559_v40 = vmul.f32 20.0, %v555_v23 }
 0x232   : > { %v507_v1 = vpop.f32.mrf.mxu0 }
 0x233   : > { %v548_v2 = vpop.f32.mrf.mxu1  ;;  %v508_v3 = vadd.f32 %v507_v1, %v1302_v25 }
 0x234   : > { %v549_v4 = vadd.f32 %v548_v2, %v1302_v25 }
 0x235   : > { %v515_v9 = vadd.f32 %v508_v3, %v1308_v28 }
 0x236   : > { %v556_v17 = vadd.f32 %v549_v4, %v1313_v31 }
 0x237   : > { %v519_v29 = vmul.f32 20.0, %v515_v9 }
 0x238   : > { %v560_v34 = vmul.f32 20.0, %v556_v17 }
 0x23a   : > { %v510_v7 = vpop.f32.mrf.mxu0 }
 0x23b   : > { %v511_v10 = vadd.f32 %v510_v7, %v1298_v19  ;;  %v551_v12 = vpop.f32.mrf.mxu1 }
 0x23c   : > { %v552_v18 = vadd.f32 %v551_v12, %v1298_v19 }
 0x23d   : > { %v516_v21 = vadd.f32 %v511_v10, %v1320_v36 }
 0x23e   : > { %v557_v24 = vadd.f32 %v552_v18, %v1323_v37 }
 0x23f   : > { %v520_v30 = vmul.f32 20.0, %v516_v21 }
 0x240   : > { %v561_v35 = vmul.f32 20.0, %v557_v24 }
 0x241   : > { %913 = vtanh.f32 %v520_v30 }
 0x242   : > { %915 = vtanh.f32 %v561_v35 }
 0x243   : > { %917 = vtanh.f32 %v519_v29 }
 0x244   : > { %919 = vtanh.f32 %v560_v34 }
 0x245   : > { %921 = vtanh.f32 %v518_v38 }
 0x246   : > { %923 = vtanh.f32 %v559_v40 }
 0x247   : > { %v914_v44 = vpop.eup %913  ;;  %925 = vtanh.f32 %v517_v41 }
 0x248   : > { %v916_v45 = vpop.eup %915  ;;  %927 = vtanh.f32 %v558_v42  ;;  %578 = vmatpush.msrb.mxu2 %v914_v44 }
 0x249   : > { %v918_v47 = vpop.eup %917  ;;  %619 = vmatpush.msrb.mxu3 %v916_v45 }
 0x24a   : > { %v920_v48 = vpop.eup %919  ;;  %579 = vmatpush.msrb.mxu2 %v918_v47 }
 0x24b   : > { %v922_v49 = vpop.eup %921  ;;  %620 = vmatpush.msrb.mxu3 %v920_v48 }
 0x24c   : > { %v924_v50 = vpop.eup %923  ;;  %580 = vmatpush.msrb.mxu2 %v922_v49 }
 0x24d   : > { %v926_v51 = vpop.eup %925  ;;  %621 = vmatpush.msrb.mxu3 %v924_v50 }
 0x24e   : > { %v928_v52 = vpop.eup %927  ;;  %581 = vmatpush.msrb.mxu2 %v926_v51 }
 0x24f   : > { %622 = vmatpush.msrb.mxu3 %v928_v52  ;;  %805 = vmatmul.msk.f32.vlgmr.msrb.gmra.mxu2 %vm307_vm0, %v1259_v11 }
 0x250   : > { %809 = vmatmul.msk.f32.vlgmr.msrb.gmra.mxu3 %vm307_vm0, %v1259_v11 }
 0x257   : > { %806 = vmatmul.msk.f32.gmra.mxu2 %vm307_vm0, %v1274_v14 }
 0x258   : > { %810 = vmatmul.msk.f32.gmra.mxu3 %vm307_vm0, %v1274_v14 }
 0x25f   : > { %807 = vmatmul.msk.f32.gmra.mxu2 %vm307_vm0, %v1283_v15 }
 0x260   : > { %811 = vmatmul.msk.f32.gmra.mxu3 %vm307_vm0, %v1283_v15 }
 0x267   : > { %808 = vmatmul.msk.f32.gmra.mxu2 %vm307_vm0, %v1292_v16 }
 0x268   : > { %812 = vmatmul.msk.f32.gmra.mxu3 %vm307_vm0, %v1292_v16 }
 0x2d2   : > { %v583_v53 = vpop.f32.mrf.mxu2 }
 0x2d3   : > { %v584_v11 = vadd.f32 %v583_v53, %v1305_v27  ;;  %v624_v54 = vpop.f32.mrf.mxu3 }
 0x2d4   : > { %v625_v55 = vadd.f32 %v624_v54, %v1305_v27 }
 0x2d5   : > { %v595_v14 = vadd.f32 %v584_v11, %v1333_v43 }
 0x2d6   : > { %v636_v56 = vadd.f32 %v625_v55, %v1338_v46 }
 0x2d7   : > { %v599_v57 = vmul.f32 20.0, %v595_v14 }
 0x2d8   : > { %v640_v58 = vmul.f32 20.0, %v636_v56 }
 0x2d9   : > { %929 = vtanh.f32 %v599_v57 }
 0x2da   : > { %931 = vtanh.f32 %v640_v58  ;;  %v586_v15 = vpop.f32.mrf.mxu2 }
 0x2db   : > { %v587_v59 = vadd.f32 %v586_v15, %v1300_v22  ;;  %v627_v60 = vpop.f32.mrf.mxu3 }
 0x2dc   : > { %v628_v16 = vadd.f32 %v627_v60, %v1300_v22 }
 0x2dd   : > { %v596_v61 = vadd.f32 %v587_v59, %v1316_v32 }
 0x2de   : > { %v637_v62 = vadd.f32 %v628_v16, %v1327_v39 }
 0x2df   : > { %v930_v27 = vpop.eup %929  ;;  %v600_v63 = vmul.f32 20.0, %v596_v61 }
 0x2e0   : > { %v932_v0 = vpop.eup %931  ;;  %648 = vst [vmem:[%s1435_s0] sm:$0xff] %v930_v27  ;;  %v641_v43 = vmul.f32 20.0, %v637_v62 }
 0x2e1   : > { %652 = vst [vmem:[%s1435_s0 + $0x8] sm:$0xff] %v932_v0  ;;  %933 = vtanh.f32 %v600_v63 }
 0x2e2   : > { %935 = vtanh.f32 %v641_v43  ;;  %v589_v46 = vpop.f32.mrf.mxu2 }
 0x2e3   : > { %v590_v22 = vadd.f32 %v589_v46, %v1302_v25  ;;  %v630_v32 = vpop.f32.mrf.mxu3 }
 0x2e4   : > { %v631_v39 = vadd.f32 %v630_v32, %v1302_v25 }
 0x2e5   : > { %v597_v1 = vadd.f32 %v590_v22, %v1308_v28 }
 0x2e6   : > { %v638_v2 = vadd.f32 %v631_v39, %v1313_v31 }
 0x2e7   : > { %v934_v3 = vpop.eup %933  ;;  %v601_v4 = vmul.f32 20.0, %v597_v1 }
 0x2e8   : > { %v936_v5 = vpop.eup %935  ;;  %649 = vst [vmem:[%s1435_s0 + $0x10] sm:$0xff] %v934_v3  ;;  %v642_v6 = vmul.f32 20.0, %v638_v2 }
 0x2e9   : > { %653 = vst [vmem:[%s1435_s0 + $0x18] sm:$0xff] %v936_v5  ;;  %937 = vtanh.f32 %v601_v4 }
 0x2ea   : > { %939 = vtanh.f32 %v642_v6  ;;  %v592_v7 = vpop.f32.mrf.mxu2 }
 0x2eb   : > { %v593_v8 = vadd.f32 %v592_v7, %v1298_v19  ;;  %v633_v25 = vpop.f32.mrf.mxu3 }
 0x2ec   : > { %v634_v9 = vadd.f32 %v633_v25, %v1298_v19 }
 0x2ed   : > { %v598_v28 = vadd.f32 %v593_v8, %v1320_v36 }
 0x2ee   : > { %v639_v31 = vadd.f32 %v634_v9, %v1323_v37 }
 0x2ef   : > { %v938_v10 = vpop.eup %937  ;;  %v602_v12 = vmul.f32 20.0, %v598_v28 }
 0x2f0   : > { %v940_v13 = vpop.eup %939  ;;  %650 = vst [vmem:[%s1435_s0 + $0x20] sm:$0xff] %v938_v10  ;;  %v643_v17 = vmul.f32 20.0, %v639_v31 }
 0x2f1   : > { %654 = vst [vmem:[%s1435_s0 + $0x28] sm:$0xff] %v940_v13  ;;  %941 = vtanh.f32 %v602_v12 }
 0x2f2   : > { %943 = vtanh.f32 %v643_v17 }
 0x2f7   : > { %v942_v19 = vpop.eup %941 }
 0x2f8   : > { %v944_v36 = vpop.eup %943  ;;  %651 = vst [vmem:[%s1435_s0 + $0x30] sm:$0xff] %v942_v19 }
 0x2f9   : > { %655 = vst [vmem:[%s1435_s0 + $0x38] sm:$0xff] %v944_v36 }
 0x2fa   : > { %1032 = shalt.err (!%p1029_p7)
}
 0x2fb   : > { %s1081_s29 = smov 256   ;;  %s1082_s13 = smov 512  }
 0x2fc   : > { %s1083_s14 = smov 16  }
 0x2fd   : > { %825 = dma.vmem_to_hbm [thread:$0]  (%p1159_p11), %s670_s26, 1024, %s672_s19, %s657_s8, %s1081_s29, %s1082_s13, %s1083_s14  }
 0x2fe PF: > { %s686_s20 = sand.u32 1, %s1063_s15   ;;  %p835_p0 = pnand %p770_p9, %p1163_p12 }
 0x2ff   : > { %s687_s17 = scalar_lea.sflag [#allocation4], %s686_s20 }
 0x300   : > { %p836_p8 = pneg %p835_p0 }
 0x302   : > { %1058 = dma.done.wait (%p836_p8), %s687_s17, 1024  }
 0x303   : > { %1060 = vsyncadd (%p836_p8), %s687_s17, 4294966272  ;;  %s1505_s6 = sld [smem:[#allocation11_spill]]  ;;  %p20_p10 = scmp.ge.s32.totalorder %s1134_s21, 4  }
 0x304   : > { %s1506_s17 = sld [smem:[#allocation12_spill]]  ;;  %s1507_s15 = smov %s1067_s16 }
 0x305   : > { %s1509_s18 = smov %s1134_s21  ;;  %22 = sbr.rel (!%p20_p10) target bundleno = 9 (0x9), region = 94 }
 0x309   : > { %s1508_s16 = smov %s1505_s6 }
 0x30a   :  { %693 = vsyncpa [#allocation3], 1 }
 0x30b   :  { %695 = vsyncpa [#allocation3 + $0x1], 1 }
 0x30c   :  { %696 = vsyncpa [#allocation6], 1 }
 0x30d   :  { %698 = vsyncpa [#allocation6 + $0x1], 1 }
 0x30e   :  { %699 = vsyncpa [#allocation4], 1 }
 0x30f   :  { %701 = vsyncpa [#allocation4 + $0x1], 1 }

</bundles_post_ra>
